<compile_context>
chip_gen: v7x
topology: tpu7x:2x2x1
jax: 0.10.0
libtpu: 0.0.40
codegen_flags: <defaults>
</compile_context>

<pallas_src>
import math
import functools

import jax
import jax.numpy as jnp
from jax.experimental import pallas as pl
from jax.experimental.pallas import tpu as pltpu


# ----------------------------- kernel body ----------------------------------

def task_head_kernel(x_ref, w1_ref, b1_ref, w2_ref, b2_ref, out_ref):
    # x_ref: (TB, Ep) compute dtype; w1_ref: (Ep, Hp); w2_ref: (Hp, Cp); biases f32.
    h = jnp.dot(x_ref[...], w1_ref[...], preferred_element_type=jnp.float32)
    h = jnp.maximum(h + b1_ref[...], 0.0)                       # f32 bias + ReLU (VPU)
    out = jnp.dot(h.astype(w2_ref.dtype), w2_ref[...],
                  preferred_element_type=jnp.float32) + b2_ref[...]
    out_ref[...] = out.astype(out_ref.dtype)


# ----------------------------- helpers ---------------------------------------

def _round_up(n, m):
    return ((n + m - 1) // m) * m


def _choose_tile_b(B, sublane, max_tile=512):
    """Static (trace-time) batch-tile choice.

    - tiny batches: single grid step, padded only to the sublane multiple
    - larger batches: >= 2 grid steps (v7x megacore), tile capped at max_tile
      (sweepable 512-2048) to amortize the ~0.35us per-grid-step overhead.
    """
    bp_min = _round_up(B, sublane)
    if bp_min <= 2 * sublane:
        return bp_min
    half = _round_up((bp_min + 1) // 2, sublane)
    return min(half, max_tile)


# ----------------------------- one-time prep + forward factory ---------------

def make_task_head_forward(params, *, compute_dtype=jnp.bfloat16,
                           out_dtype=jnp.float32, max_tile_b=512):
    """Fold + pad the weights once, return a jitted forward(x) closure.

    Equivalent to TaskHead.forward(x) in eval mode, x: (B, E) float32.
    """
    E = params["out_proj_weight"].shape[0]
    H = params["w1"].shape[0]
    C = params["w2"].shape[0]

    # --- offline glue (f32): the q/k branch is dead work (softmax over 1 key == 1) ---
    wv = params["in_proj_weight"][2 * E:3 * E]                  # (E, E)
    bv = params["in_proj_bias"][2 * E:3 * E]                    # (E,)
    wo = params["out_proj_weight"]                              # (E, E)
    bo = params["out_proj_bias"]                                # (E,)
    w1, b1 = params["w1"], params["b1"]                         # (H, E), (H,)
    w2, b2 = params["w2"], params["b2"]                         # (C, H), (C,)

    # attn_out = x @ Wv^T @ Wo^T + (bv @ Wo^T + bo)
    # h_pre    = attn_out @ W1^T + b1  ==  x @ W1f + b1f
    w_vo = wv.T @ wo.T                                          # (E, E)
    b_vo = bv @ wo.T + bo                                       # (E,)
    w1f = w_vo @ w1.T                                           # (E, H)
    b1f = b_vo @ w1.T + b1                                      # (H,)
    w2t = w2.T                                                  # (H, C)

    # --- pad once to lane-dense shapes, cast once to the MXU compute dtype ---
    Ep, Hp, Cp = _round_up(E, 128), _round_up(H, 128), _round_up(C, 128)
    w1p = jnp.zeros((Ep, Hp), compute_dtype).at[:E, :H].set(w1f.astype(compute_dtype))
    b1p = jnp.zeros((1, Hp), jnp.float32).at[:, :H].set(b1f[None, :])
    w2p = jnp.zeros((Hp, Cp), compute_dtype).at[:H, :C].set(w2t.astype(compute_dtype))
    b2p = jnp.zeros((1, Cp), jnp.float32).at[:, :C].set(b2[None, :])
    w1p, b1p, w2p, b2p = jax.device_put((w1p, b1p, w2p, b2p))

    sublane = 16 if compute_dtype == jnp.bfloat16 else 8
    full = lambda shape: pl.BlockSpec(shape, lambda i: (0, 0))

    @jax.jit
    def _apply(x, w1p, b1p, w2p, b2p):
        B = x.shape[0]
        tile_b = _choose_tile_b(B, sublane, max_tile_b)         # static at trace time
        Bp = _round_up(B, tile_b)

        xp = jnp.zeros((Bp, Ep), compute_dtype).at[:B, :E].set(x.astype(compute_dtype))

        out = pl.pallas_call(
            task_head_kernel,
            out_shape=jax.ShapeDtypeStruct((Bp, Cp), out_dtype),
            grid_spec=pltpu.PrefetchScalarGridSpec(
                num_scalar_prefetch=0,
                grid=(Bp // tile_b,),
                in_specs=[
                    pl.BlockSpec((tile_b, Ep), lambda i: (i, 0)),   # x tile
                    full((Ep, Hp)), full((1, Hp)),                  # fused W1, b1
                    full((Hp, Cp)), full((1, Cp)),                  # W2^T, b2
                ],
                out_specs=pl.BlockSpec((tile_b, Cp), lambda i: (i, 0)),
            ),
            compiler_params=pltpu.CompilerParams(
                dimension_semantics=("parallel",)),
        )(xp, w1p, b1p, w2p, b2p)

        return out[:B, :C]

    def forward(x):
        return _apply(x, w1p, b1p, w2p, b2p)

    return forward


# ----------------------------- params + reference ----------------------------

def init_params(key, input_dim, hidden_dim, num_classes):
    ks = jax.random.split(key, 8)
    s = lambda fan_in: 1.0 / math.sqrt(fan_in)
    return {
        "in_proj_weight": jax.random.uniform(ks[0], (3 * input_dim, input_dim),
                                             jnp.float32, -s(input_dim), s(input_dim)),
        "in_proj_bias": jax.random.uniform(ks[1], (3 * input_dim,),
                                           jnp.float32, -s(input_dim), s(input_dim)),
        "out_proj_weight": jax.random.uniform(ks[2], (input_dim, input_dim),
                                              jnp.float32, -s(input_dim), s(input_dim)),
        "out_proj_bias": jax.random.uniform(ks[3], (input_dim,),
                                            jnp.float32, -s(input_dim), s(input_dim)),
        "w1": jax.random.uniform(ks[4], (hidden_dim, input_dim),
                                 jnp.float32, -s(input_dim), s(input_dim)),
        "b1": jax.random.uniform(ks[5], (hidden_dim,),
                                 jnp.float32, -s(input_dim), s(input_dim)),
        "w2": jax.random.uniform(ks[6], (num_classes, hidden_dim),
                                 jnp.float32, -s(hidden_dim), s(hidden_dim)),
        "b2": jax.random.uniform(ks[7], (num_classes,),
                                 jnp.float32, -s(hidden_dim), s(hidden_dim)),
    }


def task_head_reference(x, p):
    # Pure-JAX reference mirroring the PyTorch forward (eval mode, no folding).
    E = x.shape[-1]
    wq, wk, wv = jnp.split(p["in_proj_weight"], 3, axis=0)
    bq, bk, bv = jnp.split(p["in_proj_bias"], 3, axis=0)
    q = x @ wq.T + bq
    k = x @ wk.T + bk
    v = x @ wv.T + bv
    score = jnp.sum(q * k, axis=-1, keepdims=True) / math.sqrt(E)
    w = jax.nn.softmax(score[..., None], axis=-1)[..., 0]       # == 1 (single key)
    attn_out = (w * v) @ p["out_proj_weight"].T + p["out_proj_bias"]
    h = jax.nn.relu(attn_out @ p["w1"].T + p["b1"])
    return h @ p["w2"].T + p["b2"]


# ----------------------------- main ------------------------------------------

if __name__ == "__main__":
    batch, input_dim, hidden_dim, num_classes = 8, 32, 64, 8

    key = jax.random.PRNGKey(0)
    k_x, k_x2, k_p = jax.random.split(key, 3)
    x = jax.random.normal(k_x, (batch, input_dim), jnp.float32)
    params = init_params(k_p, input_dim, hidden_dim, num_classes)

    ref = task_head_reference(x, params)

    # f32 compute path: tight tolerance (only weight-fold reassociation differs).
    fwd_f32 = make_task_head_forward(params, compute_dtype=jnp.float32)
    out_f32 = jax.block_until_ready(fwd_f32(x))
    assert out_f32.shape == (batch, num_classes)
    assert jnp.allclose(out_f32, ref, atol=1e-4, rtol=1e-4), "f32 mismatch vs reference"

    # bf16 MXU path (production config): bf16-appropriate tolerance.
    fwd_bf16 = make_task_head_forward(params, compute_dtype=jnp.bfloat16)
    out_bf16 = jax.block_until_ready(fwd_bf16(x))
    assert out_bf16.shape == (batch, num_classes)
    assert jnp.allclose(out_bf16, ref, atol=1e-2, rtol=1e-2), "bf16 mismatch vs reference"

    # Larger batch: exercises the >=2-grid-step path (v7x megacore sharding) + padding.
    x_big = jax.random.normal(k_x2, (200, input_dim), jnp.float32)
    ref_big = task_head_reference(x_big, params)
    out_big = jax.block_until_ready(fwd_bf16(x_big))
    assert out_big.shape == (200, num_classes)
    assert jnp.allclose(out_big, ref_big, atol=1e-2, rtol=1e-2), "bf16 big-batch mismatch"

    print("KERNEL_OK")
</pallas_src>

<mosaic_0001>
module attributes {stable_mosaic.version = 11 : i64} {
  func.func @task_head_kernel(%arg0: i32, %arg1: memref<8x128xf32, #tpu.memory_space<vmem>>, %arg2: memref<128x128xf32, #tpu.memory_space<vmem>>, %arg3: memref<1x128xf32, #tpu.memory_space<vmem>>, %arg4: memref<128x128xf32, #tpu.memory_space<vmem>>, %arg5: memref<1x128xf32, #tpu.memory_space<vmem>>, %arg6: memref<8x128xf32, #tpu.memory_space<vmem>>) attributes {dimension_semantics = [#tpu.dimension_semantics<parallel>], iteration_bounds = array<i64: 1>, scalar_prefetch = 0 : i64, scratch_operands = 0 : i64, tpu.core_type = #tpu.core_type<tc>, window_params = [{transform_indices = @transform_0, window_bounds = array<i64: 8, 128>}, {pipeline_mode = #tpu.pipeline_mode<synchronous>, transform_indices = @transform_1, window_bounds = array<i64: 128, 128>}, {pipeline_mode = #tpu.pipeline_mode<synchronous>, transform_indices = @transform_2, window_bounds = array<i64: 1, 128>}, {pipeline_mode = #tpu.pipeline_mode<synchronous>, transform_indices = @transform_3, window_bounds = array<i64: 128, 128>}, {pipeline_mode = #tpu.pipeline_mode<synchronous>, transform_indices = @transform_4, window_bounds = array<i64: 1, 128>}, {transform_indices = @transform_5, window_bounds = array<i64: 8, 128>}]} {
    %c0 = arith.constant 0 : index
    %c0_0 = arith.constant 0 : index
    %0 = vector.load %arg1[%c0, %c0_0] : memref<8x128xf32, #tpu.memory_space<vmem>>, vector<8x128xf32>
    %c0_1 = arith.constant 0 : index
    %c0_2 = arith.constant 0 : index
    %1 = vector.load %arg2[%c0_1, %c0_2] : memref<128x128xf32, #tpu.memory_space<vmem>>, vector<128x128xf32>
    %cst = arith.constant dense<0.000000e+00> : vector<8x128xf32>
    %2 = tpu.matmul %0, %1, %cst {dimension_numbers = #tpu.dot_dimension_numbers<[1], [0], [0], [1], [0, 0, 1, 1], [], []>} : vector<8x128xf32>, vector<128x128xf32>, vector<8x128xf32> -> vector<8x128xf32>
    %c0_3 = arith.constant 0 : index
    %c0_4 = arith.constant 0 : index
    %3 = vector.load %arg3[%c0_3, %c0_4] : memref<1x128xf32, #tpu.memory_space<vmem>>, vector<1x128xf32>
    %4 = vector.broadcast %3 : vector<1x128xf32> to vector<8x128xf32>
    %5 = arith.addf %2, %4 : vector<8x128xf32>
    %cst_5 = arith.constant 0.000000e+00 : f32
    %6 = vector.broadcast %cst_5 : f32 to vector<8x128xf32>
    %7 = arith.maximumf %5, %6 : vector<8x128xf32>
    %c0_6 = arith.constant 0 : index
    %c0_7 = arith.constant 0 : index
    %8 = vector.load %arg4[%c0_6, %c0_7] : memref<128x128xf32, #tpu.memory_space<vmem>>, vector<128x128xf32>
    %cst_8 = arith.constant dense<0.000000e+00> : vector<8x128xf32>
    %9 = tpu.matmul %7, %8, %cst_8 {dimension_numbers = #tpu.dot_dimension_numbers<[1], [0], [0], [1], [0, 0, 1, 1], [], []>} : vector<8x128xf32>, vector<128x128xf32>, vector<8x128xf32> -> vector<8x128xf32>
    %c0_9 = arith.constant 0 : index
    %c0_10 = arith.constant 0 : index
    %10 = vector.load %arg5[%c0_9, %c0_10] : memref<1x128xf32, #tpu.memory_space<vmem>>, vector<1x128xf32>
    %11 = vector.broadcast %10 : vector<1x128xf32> to vector<8x128xf32>
    %12 = arith.addf %9, %11 : vector<8x128xf32>
    %c0_11 = arith.constant 0 : index
    %c0_12 = arith.constant 0 : index
    %13 = vector.load %arg6[%c0_11, %c0_12] : memref<8x128xf32, #tpu.memory_space<vmem>>, vector<8x128xf32>
    tpu.vector_store %arg6[%c0_11, %c0_12], %12 {strides = array<i32>} : memref<8x128xf32, #tpu.memory_space<vmem>>, vector<8x128xf32>,
    return
  }
  func.func @transform_0(%arg0: i32) -> (i32, i32) {
    %c0_i32 = arith.constant 0 : i32
    %c0_i32_0 = arith.constant 0 : i32
    return %arg0, %c0_i32 : i32, i32
  }
  func.func @transform_1(%arg0: i32) -> (i32, i32) {
    %c0_i32 = arith.constant 0 : i32
    %c0_i32_0 = arith.constant 0 : i32
    %c0_i32_1 = arith.constant 0 : i32
    return %c0_i32, %c0_i32_0 : i32, i32
  }
  func.func @transform_2(%arg0: i32) -> (i32, i32) {
    %c0_i32 = arith.constant 0 : i32
    %c0_i32_0 = arith.constant 0 : i32
    %c0_i32_1 = arith.constant 0 : i32
    return %c0_i32, %c0_i32_0 : i32, i32
  }
  func.func @transform_3(%arg0: i32) -> (i32, i32) {
    %c0_i32 = arith.constant 0 : i32
    %c0_i32_0 = arith.constant 0 : i32
    %c0_i32_1 = arith.constant 0 : i32
    return %c0_i32, %c0_i32_0 : i32, i32
  }
  func.func @transform_4(%arg0: i32) -> (i32, i32) {
    %c0_i32 = arith.constant 0 : i32
    %c0_i32_0 = arith.constant 0 : i32
    %c0_i32_1 = arith.constant 0 : i32
    return %c0_i32, %c0_i32_0 : i32, i32
  }
  func.func @transform_5(%arg0: i32) -> (i32, i32) {
    %c0_i32 = arith.constant 0 : i32
    %c0_i32_0 = arith.constant 0 : i32
    return %arg0, %c0_i32 : i32, i32
  }
}

</mosaic_0001>

<bundles_post_ra>
// kernel: _apply.1
= control target key start
LH: loop header
LB: loop body
LE: loop exit
PB: predicated region body
PF: predicated region fallthrough
CT: control target
= control target key end

     0   :  { %10 = vsyncpa [#allocation3], 0  ;;  %s587_s0 = inlined_call_operand.vmem [shape: f32[8,128], index: 0, kind: input, shape index: {}]   ;;  %s588_s1 = inlined_call_operand.hbm [shape: f32[128,128], index: 1, kind: input, shape index: {}]   ;;  %s589_s2 = inlined_call_operand.vmem [shape: f32[1,128], index: 2, kind: input, shape index: {}]   ;;  %s590_s3 = inlined_call_operand.hbm [shape: f32[128,128], index: 3, kind: input, shape index: {}]   ;;  %s591_s4 = inlined_call_operand.vmem [shape: f32[1,128], index: 4, kind: input, shape index: {}]   ;;  %s592_s5 = inlined_call_operand.hbm [shape: f32[8,128], index: 5, kind: output, shape index: {}]  }
   0x1   :  { %11 = vsyncpa [#allocation6], 0 }
   0x2   :  { %12 = vsyncpa [#allocation4], 0  ;;  %s488_s18 = smov [#allocation2]   ;;  %s416_s22 = scalar_lea.hbm %s588_s1, 2048 }
   0x3   :  { %s20_s19 = sshll.u32 %s488_s18, 4  ;;  %p417_p0 = scmp.ne.s32.totalorder %s588_s1, %s416_s22  ;;  %s21_s19 = int_to_ptr.vmem [resolvable:$true] %s20_s19 }
   0x4   :  { %p420_p1 = scmp.lt.u32.totalorder %s416_s22, %s588_s1 }
   0x6   :  { %p422_p2 = pnand %p420_p1, %p417_p0 }
   0x8   :  { %425 = shalt.err (!%p422_p2)
}
   0x9   :  { %s426_s27 = scalar_lea.vmem %s21_s19, 2048  ;;  %p431_p4 = scmp.lt.s32.totalorder %s21_s19, %s21_s19 }
   0xa   :  { %p427_p3 = scmp.ne.s32.totalorder %s21_s19, %s426_s27  ;;  %p432_p5 = scmp.lt.s32.totalorder %s426_s27, %s426_s27 }
   0xc   :  { %p433_p6 = por %p432_p5, %p431_p4 }
   0xe   :  { %p434_p7 = pnand %p433_p6, %p427_p3 }
  0x10   :  { %437 = shalt.err (!%p434_p7)
}
  0x11   :  { %s489_s28 = smov 128   ;;  %s490_s29 = smov 8  }
  0x12   :  { %26 = dma.hbm_to_vmem [thread:$0]  %s588_s1, 2048, %s21_s19, [#allocation3], %s489_s28, %s489_s28, %s490_s29  }
  0x13   :  { %s491_s7 = smov [#allocation5]   ;;  %s438_s11 = scalar_lea.hbm %s590_s3, 2048 }
  0x14   :  { %s34_s8 = sshll.u32 %s491_s7, 4  ;;  %p439_p8 = scmp.ne.s32.totalorder %s590_s3, %s438_s11  ;;  %s35_s8 = int_to_ptr.vmem [resolvable:$true] %s34_s8 }
  0x15   :  { %p442_p9 = scmp.lt.u32.totalorder %s438_s11, %s590_s3 }
  0x17   :  { %p444_p10 = pnand %p442_p9, %p439_p8 }
  0x19   :  { %447 = shalt.err (!%p444_p10)
}
  0x1a   :  { %s448_s16 = scalar_lea.vmem %s35_s8, 2048  ;;  %p453_p12 = scmp.lt.s32.totalorder %s35_s8, %s35_s8 }
  0x1b   :  { %p449_p11 = scmp.ne.s32.totalorder %s35_s8, %s448_s16  ;;  %p454_p13 = scmp.lt.s32.totalorder %s448_s16, %s448_s16 }
  0x1d   :  { %p455_p0 = por %p454_p13, %p453_p12 }
  0x1f   :  { %p456_p1 = pnand %p455_p0, %p449_p11 }
  0x21   :  { %459 = shalt.err (!%p456_p1)
}
  0x22   :  { %40 = dma.hbm_to_vmem [thread:$0]  %s590_s3, 2048, %s35_s8, [#allocation6], %s489_s28, %s489_s28, %s490_s29  }
  0x23   :  { %482 = dma.done.wait [#allocation3], 2048  }
  0x24   :  { %483 = vsyncadd [#allocation3], 4294965248 }
  0x25   :  { %484 = dma.done.wait [#allocation6], 2048  }
  0x26   :  { %485 = vsyncadd [#allocation6], 4294965248  ;;  %v492_v0 = vmov 0.0|0.0   ;;  %vm493_vm0 = vmmov 0   ;;  %v494_v1 = vmov 0.0   ;;  %v50_v2 = vld [vmem:[#allocation2] sm:$0xff] }
  0x27   :  { %360 = vmatprep.subr.bf16.mxu0 %v492_v0  ;;  %322 = vmatprep.mubr.msk.f32.mxu0 %vm493_vm0, %v494_v1  ;;  %v51_v3 = vld [vmem:[#allocation2 + $0x8] sm:$0xff]  ;;  %v52_v4 = vld [vmem:[#allocation2 + $0x10] sm:$0xff]  ;;  %v53_v6 = vld [vmem:[#allocation2 + $0x18] sm:$0xff] }
  0x28   :  { %384 = vmatprep.subr.bf16.mxu1 %v492_v0  ;;  %357 = vmatprep.mubr.msk.f32.mxu1 %vm493_vm0, %v494_v1  ;;  %v361_v5 = vpack.c.bf16 %v51_v3, %v50_v2  ;;  %v364_v7 = vpack.c.bf16 %v53_v6, %v52_v4  ;;  %v54_v8 = vld [vmem:[#allocation2 + $0x20] sm:$0xff]  ;;  %v55_v9 = vld [vmem:[#allocation2 + $0x28] sm:$0xff]  ;;  %v146_v12 = vld [vmem:[#allocation5 + $0x10] sm:$0xff] }
  0x29   :  { %v144_v10 = vld [vmem:[#allocation5] sm:$0xff]  ;;  %v145_v11 = vld [vmem:[#allocation5 + $0x8] sm:$0xff]  ;;  %v147_v13 = vld [vmem:[#allocation5 + $0x18] sm:$0xff]  ;;  %v367_v14 = vpack.c.bf16 %v55_v9, %v54_v8 }
  0x2a   :  { %362 = vmatpush3.bf16.msra.mxu0 %v361_v5  ;;  %v385_v15 = vpack.c.bf16 %v145_v11, %v144_v10  ;;  %v56_v16 = vld [vmem:[#allocation2 + $0x30] sm:$0xff]  ;;  %v57_v17 = vld [vmem:[#allocation2 + $0x38] sm:$0xff]  ;;  %v388_v18 = vpack.c.bf16 %v147_v13, %v146_v12  ;;  %v148_v19 = vld [vmem:[#allocation5 + $0x20] sm:$0xff] }
  0x2b   :  { %363 = vmatprep.subr.bf16.mxu0 %v492_v0  ;;  %v149_v20 = vld [vmem:[#allocation5 + $0x28] sm:$0xff]  ;;  %v370_v21 = vpack.c.bf16 %v57_v17, %v56_v16  ;;  %v58_v22 = vld [vmem:[#allocation2 + $0x40] sm:$0xff]  ;;  %v150_v25 = vld [vmem:[#allocation5 + $0x30] sm:$0xff] }
  0x2c   :  { %386 = vmatpush3.bf16.msra.mxu1 %v385_v15  ;;  %v59_v23 = vld [vmem:[#allocation2 + $0x48] sm:$0xff]  ;;  %v391_v24 = vpack.c.bf16 %v149_v20, %v148_v19  ;;  %v151_v26 = vld [vmem:[#allocation5 + $0x38] sm:$0xff]  ;;  %v60_v28 = vld [vmem:[#allocation2 + $0x50] sm:$0xff] }
  0x2d   :  { %387 = vmatprep.subr.bf16.mxu1 %v492_v0  ;;  %v373_v27 = vpack.c.bf16 %v59_v23, %v58_v22  ;;  %v61_v29 = vld [vmem:[#allocation2 + $0x58] sm:$0xff]  ;;  %v394_v30 = vpack.c.bf16 %v151_v26, %v150_v25  ;;  %v152_v31 = vld [vmem:[#allocation5 + $0x40] sm:$0xff]  ;;  %v153_v32 = vld [vmem:[#allocation5 + $0x48] sm:$0xff] }
  0x2e   :  { %365 = vmatpush3.bf16.msra.mxu0 %v364_v7  ;;  %v376_v33 = vpack.c.bf16 %v61_v29, %v60_v28  ;;  %v62_v34 = vld [vmem:[#allocation2 + $0x60] sm:$0xff]  ;;  %v63_v35 = vld [vmem:[#allocation2 + $0x68] sm:$0xff]  ;;  %v397_v36 = vpack.c.bf16 %v153_v32, %v152_v31  ;;  %v154_v37 = vld [vmem:[#allocation5 + $0x50] sm:$0xff] }
  0x2f   :  { %366 = vmatprep.subr.bf16.mxu0 %v492_v0  ;;  %v155_v38 = vld [vmem:[#allocation5 + $0x58] sm:$0xff]  ;;  %v379_v39 = vpack.c.bf16 %v63_v35, %v62_v34  ;;  %v64_v40 = vld [vmem:[#allocation2 + $0x70] sm:$0xff]  ;;  %v156_v43 = vld [vmem:[#allocation5 + $0x60] sm:$0xff] }
  0x30   :  { %389 = vmatpush3.bf16.msra.mxu1 %v388_v18  ;;  %v65_v41 = vld [vmem:[#allocation2 + $0x78] sm:$0xff]  ;;  %v400_v42 = vpack.c.bf16 %v155_v38, %v154_v37  ;;  %v157_v44 = vld [vmem:[#allocation5 + $0x68] sm:$0xff]  ;;  %v49_v47 = vld [vmem:[%s587_s0] sm:$0xff]  ;;  %s495_s0 = smov [#allocation7]  }
  0x31   :  { %390 = vmatprep.subr.bf16.mxu1 %v492_v0  ;;  %v382_v45 = vpack.c.bf16 %v65_v41, %v64_v40  ;;  %v403_v46 = vpack.c.bf16 %v157_v44, %v156_v43  ;;  %v158_v48 = vld [vmem:[#allocation5 + $0x70] sm:$0xff]  ;;  %v159_v49 = vld [vmem:[#allocation5 + $0x78] sm:$0xff]  ;;  %v254_v51 = vld [vmem:[%s589_s2] ss:$0 sm:$0xff]  ;;  %s244_s23 = sshll.u32 %s495_s0, 4  ;;  %s245_s23 = int_to_ptr.vmem [resolvable:$true] %s244_s23 }
  0x32   :  { %368 = vmatpush3.bf16.msra.mxu0 %v367_v14  ;;  %v406_v50 = vpack.c.bf16 %v159_v49, %v158_v48  ;;  %v255_v56 = vld [vmem:[%s591_s4] ss:$0 sm:$0xff]  ;;  %s460_s24 = scalar_lea.vmem %s245_s23, 128  ;;  %p465_p3 = scmp.lt.s32.totalorder %s245_s23, %s245_s23 }
  0x33   :  { %369 = vmatprep.subr.bf16.mxu0 %v492_v0  ;;  %p461_p2 = scmp.ne.s32.totalorder %s245_s23, %s460_s24  ;;  %p466_p4 = scmp.lt.s32.totalorder %s460_s24, %s460_s24 }
  0x34   :  { %392 = vmatpush3.bf16.msra.mxu1 %v391_v24 }
  0x35   :  { %393 = vmatprep.subr.bf16.mxu1 %v492_v0  ;;  %p467_p5 = por %p466_p4, %p465_p3 }
  0x36   :  { %371 = vmatpush3.bf16.msra.mxu0 %v370_v21 }
  0x37   :  { %372 = vmatprep.subr.bf16.mxu0 %v492_v0  ;;  %p468_p6 = pnand %p467_p5, %p461_p2 }
  0x38   :  { %395 = vmatpush3.bf16.msra.mxu1 %v394_v30 }
  0x39   :  { %396 = vmatprep.subr.bf16.mxu1 %v492_v0 }
  0x3a   :  { %374 = vmatpush3.bf16.msra.mxu0 %v373_v27 }
  0x3b   :  { %375 = vmatprep.subr.bf16.mxu0 %v492_v0 }
  0x3c   :  { %398 = vmatpush3.bf16.msra.mxu1 %v397_v36 }
  0x3d   :  { %399 = vmatprep.subr.bf16.mxu1 %v492_v0 }
  0x3e   :  { %377 = vmatpush3.bf16.msra.mxu0 %v376_v33 }
  0x3f   :  { %378 = vmatprep.subr.bf16.mxu0 %v492_v0 }
  0x40   :  { %401 = vmatpush3.bf16.msra.mxu1 %v400_v42 }
  0x41   :  { %402 = vmatprep.subr.bf16.mxu1 %v492_v0 }
  0x42   :  { %380 = vmatpush3.bf16.msra.mxu0 %v379_v39 }
  0x43   :  { %381 = vmatprep.subr.bf16.mxu0 %v492_v0 }
  0x44   :  { %404 = vmatpush3.bf16.msra.mxu1 %v403_v46 }
  0x45   :  { %405 = vmatprep.subr.bf16.mxu1 %v492_v0 }
  0x46   :  { %383 = vmatpush3.bf16.msra.mxu0 %v382_v45 }
  0x48   :  { %407 = vmatpush3.bf16.msra.mxu1 %v406_v50 }
  0x49   :  { %323 = vmatmul.mubr.f32.vlgmr.msra.gmra.mrb[0].mxu0 %v49_v47 }
 0x11c   :  { %v139_v52 = vpop.f32.mrb[0].mxu0 }
 0x11d   :  { %v140_v53 = vadd.f32 %v254_v51, %v139_v52  ;;  %v324_v54 = vpop.f32.mrb[1].mxu0 }
 0x11f   :  { %v143_v55 = vmax.f32 %v140_v53, 0.0 }
 0x121   :  { %358 = vmatmul.mubr.f32.vlgmr.msra.gmra.mrb[0].mxu1 %v143_v55 }
 0x1f4   :  { %v233_v57 = vpop.f32.mrb[0].mxu1 }
 0x1f5   :  { %v234_v58 = vadd.f32 %v255_v56, %v233_v57  ;;  %v359_v59 = vpop.f32.mrb[1].mxu1 }
 0x1f7   :  { %237 = vst [vmem:[#allocation7] sm:$0xff] %v234_v58 }
 0x1f8   :  { %471 = shalt.err (!%p468_p6)
}
 0x1f9   :  { %s472_s26 = scalar_lea.hbm %s592_s5, 128 }
 0x1fa   :  { %p473_p7 = scmp.ne.s32.totalorder %s592_s5, %s472_s26  ;;  %p476_p8 = scmp.lt.u32.totalorder %s472_s26, %s592_s5 }
 0x1fc   :  { %p478_p9 = pnand %p476_p8, %p473_p7 }
 0x1fe   :  { %481 = shalt.err (!%p478_p9)
}
 0x1ff   :  { %247 = dma.vmem_to_hbm [thread:$0]  %s245_s23, 128, %s592_s5, [#allocation4]  }
 0x200   :  { %486 = dma.done.wait [#allocation4], 128  }
 0x201   :  { %487 = vsyncadd [#allocation4], 4294967168 }
 0x202   :  { %251 = vsyncpa [#allocation3], 1 }
 0x203   :  { %252 = vsyncpa [#allocation6], 1 }
 0x204   :  { %253 = vsyncpa [#allocation4], 1 }

</bundles_post_ra>
